<compile_context>
chip_gen: v7x
topology: tpu7x:2x2x1
jax: 0.10.0
libtpu: 0.0.40
codegen_flags: <defaults>
</compile_context>

<pallas_src>
import functools
import math

import jax
import jax.numpy as jnp
from jax.experimental import pallas as pl
from jax.experimental.pallas import tpu as pltpu

LANE = 128
SUBLANE = 8


def _round_up(n: int, m: int) -> int:
    return ((n + m - 1) // m) * m


def _pad2(a, rows, cols):
    return jnp.pad(a, ((0, rows - a.shape[0]), (0, cols - a.shape[1])))


def _vmem_limit_bytes() -> int:
    """~96 MiB on v5e/v6e (128 MiB physical), ~48 MiB on v7x (64 MiB)."""
    cap = 64 * 1024 * 1024
    try:
        info = pltpu.get_tpu_info()
        cap = int(getattr(info, "vmem_capacity_bytes", cap))
    except Exception:
        pass
    return min((cap * 3) // 4, 100 * 1024 * 1024)


def _batch_tile(batch: int) -> int:
    """Rows per grid step. 256 fills the 256-wide MXU on v6e/v7x for large
    batches (while keeping >=2 grid steps so the 'parallel' axis can shard
    across v7x's two TensorCores); v5e's 4x128^2 MXU keeps 128 optimal."""
    if batch <= 256:
        return min(_round_up(batch, SUBLANE), 128)
    try:
        kind = jax.devices()[0].device_kind.lower()
    except Exception:
        kind = ""
    small_mxu = ("v5 lite" in kind) or ("v5e" in kind) or ("v5litepod" in kind)
    if small_mxu or batch < 512:
        return 128
    return 256


# --------------------------------------------------------------------------
# Fused kernel body.  Refs (in order):
#   inv_sigma (SMEM [1,1] f32),
#   x tile    ([tm, in_pad] f32, pipelined over the batch grid),
#   w_0 .. w_{n_hidden-1}   (untiled VMEM, bf16, pre-transposed [K, N]),
#   b_hidden  (untiled VMEM, f32 [n_hidden, hid_pad]),
#   w_out     (untiled VMEM, bf16 [hid_pad, out_pad], SN linear pre-transposed),
#   b_out     (untiled VMEM, f32 [1, out_pad]),
#   out tile  ([tm, out_pad] f32)
# Layer loop is unrolled in Python (n_hidden is static).
# --------------------------------------------------------------------------
def _fused_mlp_kernel(inv_sigma_ref, x_ref, *refs, n_hidden, neg_slope):
    o_ref = refs[-1]
    w_hid = refs[:n_hidden]
    b_hid_ref = refs[n_hidden]
    w_out_ref = refs[n_hidden + 1]
    b_out_ref = refs[n_hidden + 2]

    h = x_ref[...]                                       # f32 [tm, in_pad]
    for i in range(n_hidden):
        w = w_hid[i][...]                                # bf16 (or f32) weights
        y = jnp.dot(h.astype(w.dtype), w,
                    preferred_element_type=jnp.float32)  # f32 accumulation
        y = y + b_hid_ref[pl.ds(i, 1), :]                # f32 bias epilogue
        h = jnp.where(y > 0, y, neg_slope * y)           # LeakyReLU(0.2)

    w = w_out_ref[...]
    y = jnp.dot(h.astype(w.dtype), w, preferred_element_type=jnp.float32)
    # SpectralNorm: x @ (W/sigma)^T + b  ==  (x @ W^T) * (1/sigma) + b
    y = y * inv_sigma_ref[0, 0] + b_out_ref[...]
    o_ref[...] = y.astype(o_ref.dtype)


def _mlp_g_fused(x_pad, w_hidden, b_hidden, w_out, b_out, inv_sigma, *,
                 out_features, neg_slope=0.2):
    """x_pad: [B, in_pad] f32 (in_pad multiple of 128); weights pre-transposed
    & lane-padded; inv_sigma: [1,1] f32 (1/sigma of the SN linear)."""
    B, in_pad = x_pad.shape
    n_hidden = len(w_hidden)
    hid_pad = w_hidden[0].shape[1]
    out_pad = w_out.shape[1]

    tm = _batch_tile(B)
    B_pad = _round_up(B, tm)
    if B_pad != B:
        x_pad = jnp.pad(x_pad, ((0, B_pad - B), (0, 0)))
    grid = (B_pad // tm,)

    w_bytes = (sum(w.size * w.dtype.itemsize for w in w_hidden)
               + w_out.size * w_out.dtype.itemsize)
    b_bytes = b_hidden.size * b_hidden.dtype.itemsize + b_out.size * b_out.dtype.itemsize
    flops = 2 * B_pad * (in_pad * hid_pad
                         + (n_hidden - 1) * hid_pad * hid_pad
                         + hid_pad * out_pad)
    bytes_accessed = (w_bytes + b_bytes
                      + x_pad.size * x_pad.dtype.itemsize
                      + B_pad * out_pad * 4)

    kernel = functools.partial(_fused_mlp_kernel, n_hidden=n_hidden,
                               neg_slope=neg_slope)

    # Untiled, single-copy VMEM residency for everything grid-invariant.
    resident_vmem = [pl.BlockSpec(memory_space=pltpu.MemorySpace.VMEM)
                     for _ in range(n_hidden + 3)]

    out = pl.pallas_call(
        kernel,
        out_shape=jax.ShapeDtypeStruct((B_pad, out_pad), jnp.float32),
        grid=grid,
        in_specs=[
            pl.BlockSpec(memory_space=pltpu.MemorySpace.SMEM),   # inv_sigma scalar
            pl.BlockSpec((tm, in_pad), lambda i: (i, 0)),        # x batch tile
            *resident_vmem,                                      # weights / biases
        ],
        out_specs=pl.BlockSpec((tm, out_pad), lambda i: (i, 0)),
        compiler_params=pltpu.CompilerParams(
            dimension_semantics=("parallel",),
            vmem_limit_bytes=_vmem_limit_bytes(),
        ),
        cost_estimate=pl.CostEstimate(flops=flops, transcendentals=0,
                                      bytes_accessed=bytes_accessed),
    )(inv_sigma, x_pad, *w_hidden, b_hidden, w_out, b_out)
    return out[:B, :out_features]


# --------------------------------------------------------------------------
# Spectral norm: one power iteration on the UNPADDED f32 weight — tiny
# matvecs, plain-JAX glue; only the scalar 1/sigma enters the kernel.
# --------------------------------------------------------------------------
def _l2normalize(v, eps=1e-12):
    return v / (jnp.linalg.norm(v) + eps)


def spectral_sigma(w, u):
    # w: [out, in] (PyTorch layout), u: [out]
    v = _l2normalize(w.T @ u)
    u_new = _l2normalize(w @ v)
    sigma = u_new @ (w @ v)
    return sigma, u_new


# --------------------------------------------------------------------------
# Parameter construction: pre-transposed, lane-padded, bf16 weights in HBM.
# --------------------------------------------------------------------------
def init_params(key, input_size, n_hidden, hidden_size, output_size,
                weight_dtype=jnp.bfloat16):
    assert n_hidden >= 1
    in_pad = _round_up(input_size, LANE)
    hid_pad = _round_up(hidden_size, LANE)
    out_pad = _round_up(output_size, LANE)

    w_hidden, b_rows = [], []
    in_f, k_pad = input_size, in_pad
    for _ in range(n_hidden):
        key, kw, kb = jax.random.split(key, 3)
        bound = 1.0 / math.sqrt(in_f)
        w = jax.random.uniform(kw, (hidden_size, in_f), jnp.float32, -bound, bound)
        b = jax.random.uniform(kb, (hidden_size,), jnp.float32, -bound, bound)
        w_hidden.append(_pad2(w.T, k_pad, hid_pad).astype(weight_dtype))
        b_rows.append(jnp.pad(b, (0, hid_pad - hidden_size)))
        in_f, k_pad = hidden_size, hid_pad
    b_hidden = jnp.stack(b_rows, axis=0)                       # [n_hidden, hid_pad] f32

    key, kw, kb, ku = jax.random.split(key, 4)
    bound = 1.0 / math.sqrt(hidden_size)
    w_sn = jax.random.uniform(kw, (output_size, hidden_size), jnp.float32, -bound, bound)
    b_sn = jax.random.uniform(kb, (output_size,), jnp.float32, -bound, bound)
    u = _l2normalize(jax.random.normal(ku, (output_size,), jnp.float32))

    return {
        "w_hidden": w_hidden,                                  # bf16 [K_pad, hid_pad]
        "b_hidden": b_hidden,                                  # f32 [n_hidden, hid_pad]
        "w_out": _pad2(w_sn.T, hid_pad, out_pad).astype(weight_dtype),
        "b_out": _pad2(b_sn.reshape(1, -1), 1, out_pad),       # f32 [1, out_pad]
        "w_sn": w_sn,                                          # f32 [out, in] for power iteration
        "u": u,                                                # f32 [out]
    }


# --------------------------------------------------------------------------
# Forward
# --------------------------------------------------------------------------
@jax.jit
def mlp_g_forward(x, params):
    """Returns (y, u_new). Caller should store u_new back into params to match
    PyTorch SpectralNorm's in-place power-iteration buffer update."""
    w_hidden = params["w_hidden"]
    output_size = params["w_sn"].shape[0]
    in_pad = w_hidden[0].shape[0]

    sigma, u_new = spectral_sigma(params["w_sn"], params["u"])
    inv_sigma = (1.0 / sigma).reshape(1, 1).astype(jnp.float32)

    x_pad = jnp.pad(x, ((0, 0), (0, in_pad - x.shape[1])))
    y = _mlp_g_fused(x_pad, w_hidden, params["b_hidden"],
                     params["w_out"], params["b_out"], inv_sigma,
                     out_features=output_size)
    return y, u_new


def mlp_g_reference(x, params):
    """Pure-JAX f32 reference on the TRUE (unpadded) shapes, using the same
    stored weights — checks both the math and the padding geometry."""
    hidden_size = params["w_sn"].shape[1]
    output_size = params["w_sn"].shape[0]
    n_hidden = len(params["w_hidden"])
    sigma, _ = spectral_sigma(params["w_sn"], params["u"])

    h = x
    in_f = x.shape[1]
    for i in range(n_hidden):
        w = params["w_hidden"][i][:in_f, :hidden_size].astype(jnp.float32)
        b = params["b_hidden"][i, :hidden_size]
        y = h @ w + b
        h = jnp.where(y > 0, y, 0.2 * y)
        in_f = hidden_size
    w = params["w_out"][:hidden_size, :output_size].astype(jnp.float32)
    b = params["b_out"][0, :output_size]
    return (h @ w) / sigma + b


# --------------------------------------------------------------------------
if __name__ == "__main__":
    batch = 8
    input_size, n_hidden, hidden_size, output_size = 16, 2, 32, 8

    key = jax.random.PRNGKey(0)
    key, kx, kp = jax.random.split(key, 3)
    x = jax.random.normal(kx, (batch, input_size), jnp.float32)
    params = init_params(kp, input_size, n_hidden, hidden_size, output_size)

    y, u_new = mlp_g_forward(x, params)
    jax.block_until_ready(y)
    assert y.shape == (batch, output_size)

    y_ref = mlp_g_reference(x, params)
    max_err = float(jnp.max(jnp.abs(y - y_ref)))
    # bf16 matmuls (f32 accumulation/epilogue): loose-ish tolerance. Passing
    # weight_dtype=jnp.float32 to init_params gives ~1e-6 parity instead.
    assert jnp.allclose(y, y_ref, rtol=5e-2, atol=5e-2), max_err

    # SpectralNorm training-mode parity: carry the updated power-iteration
    # vector forward, like PyTorch's in-place `u` buffer update.
    params["u"] = u_new

    print("KERNEL_OK")
</pallas_src>

<mosaic_0001>
module attributes {stable_mosaic.version = 11 : i64} {
  func.func @_fused_mlp_kernel(%arg0: i32, %arg1: memref<1x1xf32, #tpu.memory_space<smem>>, %arg2: memref<8x128xf32, #tpu.memory_space<vmem>>, %arg3: memref<128x128xbf16, #tpu.memory_space<vmem>>, %arg4: memref<128x128xbf16, #tpu.memory_space<vmem>>, %arg5: memref<2x128xf32, #tpu.memory_space<vmem>>, %arg6: memref<128x128xbf16, #tpu.memory_space<vmem>>, %arg7: memref<1x128xf32, #tpu.memory_space<vmem>>, %arg8: memref<8x128xf32, #tpu.memory_space<vmem>>) attributes {dimension_semantics = [#tpu.dimension_semantics<parallel>], iteration_bounds = array<i64: 1>, scalar_prefetch = 0 : i64, scratch_operands = 0 : i64, tpu.core_type = #tpu.core_type<tc>, window_params = [{transform_indices = @transform_0, window_bounds = array<i64: 1, 1>}, {transform_indices = @transform_1, window_bounds = array<i64: 8, 128>}, {pipeline_mode = #tpu.pipeline_mode<synchronous>, transform_indices = @transform_2, window_bounds = array<i64: 128, 128>}, {pipeline_mode = #tpu.pipeline_mode<synchronous>, transform_indices = @transform_3, window_bounds = array<i64: 128, 128>}, {pipeline_mode = #tpu.pipeline_mode<synchronous>, transform_indices = @transform_4, window_bounds = array<i64: 2, 128>}, {pipeline_mode = #tpu.pipeline_mode<synchronous>, transform_indices = @transform_5, window_bounds = array<i64: 128, 128>}, {pipeline_mode = #tpu.pipeline_mode<synchronous>, transform_indices = @transform_6, window_bounds = array<i64: 1, 128>}, {transform_indices = @transform_7, window_bounds = array<i64: 8, 128>}]} {
    %c0 = arith.constant 0 : index
    %c0_0 = arith.constant 0 : index
    %0 = vector.load %arg2[%c0, %c0_0] : memref<8x128xf32, #tpu.memory_space<vmem>>, vector<8x128xf32>
    %c0_1 = arith.constant 0 : index
    %c0_2 = arith.constant 0 : index
    %1 = vector.load %arg3[%c0_1, %c0_2] : memref<128x128xbf16, #tpu.memory_space<vmem>>, vector<128x128xbf16>
    %2 = arith.truncf %0 : vector<8x128xf32> to vector<8x128xbf16>
    %cst = arith.constant dense<0.000000e+00> : vector<8x128xf32>
    %3 = tpu.matmul %2, %1, %cst {dimension_numbers = #tpu.dot_dimension_numbers<[1], [0], [0], [1], [0, 0, 1, 1], [], []>} : vector<8x128xbf16>, vector<128x128xbf16>, vector<8x128xf32> -> vector<8x128xf32>
    %c0_3 = arith.constant 0 : index
    %c0_4 = arith.constant 0 : index
    %4 = vector.load %arg5[%c0_3, %c0_4] : memref<2x128xf32, #tpu.memory_space<vmem>>, vector<1x128xf32>
    %5 = vector.broadcast %4 : vector<1x128xf32> to vector<8x128xf32>
    %6 = arith.addf %3, %5 : vector<8x128xf32>
    %cst_5 = arith.constant 0.000000e+00 : f32
    %7 = vector.broadcast %cst_5 : f32 to vector<8x128xf32>
    %8 = arith.cmpf ogt, %6, %7 : vector<8x128xf32>
    %cst_6 = arith.constant 2.000000e-01 : f32
    %9 = vector.broadcast %cst_6 : f32 to vector<8x128xf32>
    %10 = arith.mulf %9, %6 : vector<8x128xf32>
    %11 = arith.select %8, %6, %10 : vector<8x128xi1>, vector<8x128xf32>
    %c0_7 = arith.constant 0 : index
    %c0_8 = arith.constant 0 : index
    %12 = vector.load %arg4[%c0_7, %c0_8] : memref<128x128xbf16, #tpu.memory_space<vmem>>, vector<128x128xbf16>
    %13 = arith.truncf %11 : vector<8x128xf32> to vector<8x128xbf16>
    %cst_9 = arith.constant dense<0.000000e+00> : vector<8x128xf32>
    %14 = tpu.matmul %13, %12, %cst_9 {dimension_numbers = #tpu.dot_dimension_numbers<[1], [0], [0], [1], [0, 0, 1, 1], [], []>} : vector<8x128xbf16>, vector<128x128xbf16>, vector<8x128xf32> -> vector<8x128xf32>
    %c1 = arith.constant 1 : index
    %c0_10 = arith.constant 0 : index
    %15 = vector.load %arg5[%c1, %c0_10] : memref<2x128xf32, #tpu.memory_space<vmem>>, vector<1x128xf32>
    %16 = vector.broadcast %15 : vector<1x128xf32> to vector<8x128xf32>
    %17 = arith.addf %14, %16 : vector<8x128xf32>
    %cst_11 = arith.constant 0.000000e+00 : f32
    %18 = vector.broadcast %cst_11 : f32 to vector<8x128xf32>
    %19 = arith.cmpf ogt, %17, %18 : vector<8x128xf32>
    %cst_12 = arith.constant 2.000000e-01 : f32
    %20 = vector.broadcast %cst_12 : f32 to vector<8x128xf32>
    %21 = arith.mulf %20, %17 : vector<8x128xf32>
    %22 = arith.select %19, %17, %21 : vector<8x128xi1>, vector<8x128xf32>
    %c0_13 = arith.constant 0 : index
    %c0_14 = arith.constant 0 : index
    %23 = vector.load %arg6[%c0_13, %c0_14] : memref<128x128xbf16, #tpu.memory_space<vmem>>, vector<128x128xbf16>
    %24 = arith.truncf %22 : vector<8x128xf32> to vector<8x128xbf16>
    %cst_15 = arith.constant dense<0.000000e+00> : vector<8x128xf32>
    %25 = tpu.matmul %24, %23, %cst_15 {dimension_numbers = #tpu.dot_dimension_numbers<[1], [0], [0], [1], [0, 0, 1, 1], [], []>} : vector<8x128xbf16>, vector<128x128xbf16>, vector<8x128xf32> -> vector<8x128xf32>
    %c0_16 = arith.constant 0 : index
    %c0_17 = arith.constant 0 : index
    %26 = memref.load %arg1[%c0_16, %c0_17] : memref<1x1xf32, #tpu.memory_space<smem>>
    %27 = vector.broadcast %26 : f32 to vector<8x128xf32>
    %28 = arith.mulf %25, %27 : vector<8x128xf32>
    %c0_18 = arith.constant 0 : index
    %c0_19 = arith.constant 0 : index
    %29 = vector.load %arg7[%c0_18, %c0_19] : memref<1x128xf32, #tpu.memory_space<vmem>>, vector<1x128xf32>
    %30 = vector.broadcast %29 : vector<1x128xf32> to vector<8x128xf32>
    %31 = arith.addf %28, %30 : vector<8x128xf32>
    %c0_20 = arith.constant 0 : index
    %c0_21 = arith.constant 0 : index
    %32 = vector.load %arg8[%c0_20, %c0_21] : memref<8x128xf32, #tpu.memory_space<vmem>>, vector<8x128xf32>
    tpu.vector_store %arg8[%c0_20, %c0_21], %31 {strides = array<i32>} : memref<8x128xf32, #tpu.memory_space<vmem>>, vector<8x128xf32>,
    return
  }
  func.func @transform_0(%arg0: i32) -> (i32, i32) {
    %c0_i32 = arith.constant 0 : i32
    %c0_i32_0 = arith.constant 0 : i32
    %c0_i32_1 = arith.constant 0 : i32
    return %c0_i32, %c0_i32_0 : i32, i32
  }
  func.func @transform_1(%arg0: i32) -> (i32, i32) {
    %c0_i32 = arith.constant 0 : i32
    %c0_i32_0 = arith.constant 0 : i32
    return %arg0, %c0_i32 : i32, i32
  }
  func.func @transform_2(%arg0: i32) -> (i32, i32) {
    %c0_i32 = arith.constant 0 : i32
    %c0_i32_0 = arith.constant 0 : i32
    %c0_i32_1 = arith.constant 0 : i32
    return %c0_i32, %c0_i32_0 : i32, i32
  }
  func.func @transform_3(%arg0: i32) -> (i32, i32) {
    %c0_i32 = arith.constant 0 : i32
    %c0_i32_0 = arith.constant 0 : i32
    %c0_i32_1 = arith.constant 0 : i32
    return %c0_i32, %c0_i32_0 : i32, i32
  }
  func.func @transform_4(%arg0: i32) -> (i32, i32) {
    %c0_i32 = arith.constant 0 : i32
    %c0_i32_0 = arith.constant 0 : i32
    %c0_i32_1 = arith.constant 0 : i32
    return %c0_i32, %c0_i32_0 : i32, i32
  }
  func.func @transform_5(%arg0: i32) -> (i32, i32) {
    %c0_i32 = arith.constant 0 : i32
    %c0_i32_0 = arith.constant 0 : i32
    %c0_i32_1 = arith.constant 0 : i32
    return %c0_i32, %c0_i32_0 : i32, i32
  }
  func.func @transform_6(%arg0: i32) -> (i32, i32) {
    %c0_i32 = arith.constant 0 : i32
    %c0_i32_0 = arith.constant 0 : i32
    %c0_i32_1 = arith.constant 0 : i32
    return %c0_i32, %c0_i32_0 : i32, i32
  }
  func.func @transform_7(%arg0: i32) -> (i32, i32) {
    %c0_i32 = arith.constant 0 : i32
    %c0_i32_0 = arith.constant 0 : i32
    return %arg0, %c0_i32 : i32, i32
  }
}

</mosaic_0001>

<bundles_post_ra>
// kernel: mlp_g_forward.1
= control target key start
LH: loop header
LB: loop body
LE: loop exit
PB: predicated region body
PF: predicated region fallthrough
CT: control target
= control target key end

     0   :  { %13 = vsyncpa [#allocation4], 0  ;;  %s786_s0 = inlined_call_operand.<no memory space> [shape: f32[1,1], index: 0, kind: input, shape index: {}]   ;;  %s787_s1 = inlined_call_operand.vmem [shape: f32[8,128], index: 1, kind: input, shape index: {}]   ;;  %s788_s2 = inlined_call_operand.vmem [shape: bf16[128,128], index: 2, kind: input, shape index: {}]   ;;  %s789_s3 = inlined_call_operand.hbm [shape: bf16[128,128], index: 3, kind: input, shape index: {}]   ;;  %s790_s4 = inlined_call_operand.vmem [shape: f32[2,128], index: 4, kind: input, shape index: {}]   ;;  %s791_s5 = inlined_call_operand.hbm [shape: bf16[128,128], index: 5, kind: input, shape index: {}]   ;;  %s792_s6 = inlined_call_operand.vmem [shape: f32[1,128], index: 6, kind: input, shape index: {}]   ;;  %s793_s7 = inlined_call_operand.hbm [shape: f32[8,128], index: 7, kind: output, shape index: {}]  }
   0x1   :  { %14 = vsyncpa [#allocation7], 0 }
   0x2   :  { %15 = vsyncpa [#allocation5], 0  ;;  %s634_s24 = smov [#allocation3]   ;;  %s562_s28 = scalar_lea.hbm %s789_s3, 1024 }
   0x3   :  { %s27_s25 = sshll.u32 %s634_s24, 4  ;;  %p563_p0 = scmp.ne.s32.totalorder %s789_s3, %s562_s28  ;;  %s28_s25 = int_to_ptr.vmem [resolvable:$true] %s27_s25 }
   0x4   :  { %p566_p1 = scmp.lt.u32.totalorder %s562_s28, %s789_s3 }
   0x6   :  { %p568_p2 = pnand %p566_p1, %p563_p0 }
   0x8   :  { %571 = shalt.err (!%p568_p2)
}
   0x9   :  { %s572_s10 = scalar_lea.vmem %s28_s25, 1024  ;;  %p577_p4 = scmp.lt.s32.totalorder %s28_s25, %s28_s25 }
   0xa   :  { %p573_p3 = scmp.ne.s32.totalorder %s28_s25, %s572_s10  ;;  %p578_p5 = scmp.lt.s32.totalorder %s572_s10, %s572_s10 }
   0xc   :  { %p579_p6 = por %p578_p5, %p577_p4 }
   0xe   :  { %p580_p7 = pnand %p579_p6, %p573_p3 }
  0x10   :  { %583 = shalt.err (!%p580_p7)
}
  0x11   :  { %s635_s11 = smov 64   ;;  %s636_s12 = smov 4  }
  0x12   :  { %33 = dma.hbm_to_vmem [thread:$0]  %s789_s3, 1024, %s28_s25, [#allocation4], %s635_s11, %s635_s11, %s636_s12  }
  0x13   :  { %s637_s15 = smov [#allocation6]   ;;  %s584_s19 = scalar_lea.hbm %s791_s5, 1024 }
  0x14   :  { %s41_s16 = sshll.u32 %s637_s15, 4  ;;  %p585_p8 = scmp.ne.s32.totalorder %s791_s5, %s584_s19  ;;  %s42_s16 = int_to_ptr.vmem [resolvable:$true] %s41_s16 }
  0x15   :  { %p588_p9 = scmp.lt.u32.totalorder %s584_s19, %s791_s5 }
  0x17   :  { %p590_p10 = pnand %p588_p9, %p585_p8 }
  0x19   :  { %593 = shalt.err (!%p590_p10)
}
  0x1a   :  { %s594_s24 = scalar_lea.vmem %s42_s16, 1024  ;;  %p599_p12 = scmp.lt.s32.totalorder %s42_s16, %s42_s16 }
  0x1b   :  { %p595_p11 = scmp.ne.s32.totalorder %s42_s16, %s594_s24  ;;  %p600_p13 = scmp.lt.s32.totalorder %s594_s24, %s594_s24 }
  0x1d   :  { %p601_p0 = por %p600_p13, %p599_p12 }
  0x1f   :  { %p602_p1 = pnand %p601_p0, %p595_p11 }
  0x21   :  { %605 = shalt.err (!%p602_p1)
}
  0x22   :  { %47 = dma.hbm_to_vmem [thread:$0]  %s791_s5, 1024, %s42_s16, [#allocation7], %s635_s11, %s635_s11, %s636_s12  }
  0x23   :  { %628 = dma.done.wait [#allocation4], 1024  }
  0x24   :  { %629 = vsyncadd [#allocation4], 4294966272 }
  0x25   :  { %630 = dma.done.wait [#allocation7], 1024  }
  0x26   :  { %631 = vsyncadd [#allocation7], 4294966272  ;;  %v638_v0 = vmov 0.0   ;;  %vm639_vm0 = vmmov 0   ;;  %v538_v1 = vld [vmem:[%s788_s2] sm:$0xff]   ;;  %v539_v2 = vld [vmem:[%s788_s2 + $0x8] sm:$0xff]   ;;  %v390_v45 = vstv %s786_s0 }
  0x27   :  { %471 = vmatprep.subr.bf16.mxu0 %v638_v0  ;;  %487 = vmatprep.mubr.msk.bf16.mxu0 %vm639_vm0, %v638_v0  ;;  %v540_v3 = vld [vmem:[%s788_s2 + $0x10] sm:$0xff]   ;;  %v546_v4 = vld [vmem:[#allocation3] sm:$0xff]   ;;  %v541_v5 = vld [vmem:[%s788_s2 + $0x18] sm:$0xff]  }
  0x28   :  { %491 = vmatprep.subr.bf16.mxu1 %v638_v0  ;;  %507 = vmatprep.mubr.msk.bf16.mxu1 %vm639_vm0, %v638_v0  ;;  %v547_v6 = vld [vmem:[#allocation3 + $0x8] sm:$0xff]   ;;  %v542_v7 = vld [vmem:[%s788_s2 + $0x20] sm:$0xff]   ;;  %v548_v8 = vld [vmem:[#allocation3 + $0x10] sm:$0xff]  }
  0x29   :  { %472 = vmatpush3.bf16.msra.mxu0 %v538_v1  ;;  %492 = vmatpush3.bf16.msra.mxu1 %v546_v4  ;;  %v543_v9 = vld [vmem:[%s788_s2 + $0x28] sm:$0xff]   ;;  %v549_v10 = vld [vmem:[#allocation3 + $0x18] sm:$0xff]   ;;  %v544_v11 = vld [vmem:[%s788_s2 + $0x30] sm:$0xff]  }
  0x2a   :  { %473 = vmatprep.subr.bf16.mxu0 %v638_v0  ;;  %493 = vmatprep.subr.bf16.mxu1 %v638_v0  ;;  %v550_v12 = vld [vmem:[#allocation3 + $0x20] sm:$0xff]   ;;  %v545_v13 = vld [vmem:[%s788_s2 + $0x38] sm:$0xff]   ;;  %v551_v15 = vld [vmem:[#allocation3 + $0x28] sm:$0xff]  }
  0x2b   :  { %v57_v14 = vld [vmem:[%s787_s1] sm:$0xff]  ;;  %v552_v17 = vld [vmem:[#allocation3 + $0x30] sm:$0xff]   ;;  %v553_v18 = vld [vmem:[#allocation3 + $0x38] sm:$0xff]  }
  0x2c   :  { %v74_v16 = vpack.c.bf16 %v57_v14, %v57_v14  ;;  %v554_v19 = vld [vmem:[#allocation6] sm:$0xff]   ;;  %v555_v20 = vld [vmem:[#allocation6 + $0x8] sm:$0xff]   ;;  %v556_v21 = vld [vmem:[#allocation6 + $0x10] sm:$0xff]  }
  0x2d   :  { %474 = vmatpush3.bf16.msra.mxu0 %v539_v2  ;;  %494 = vmatpush3.bf16.msra.mxu1 %v547_v6  ;;  %v557_v22 = vld [vmem:[#allocation6 + $0x18] sm:$0xff]   ;;  %v558_v23 = vld [vmem:[#allocation6 + $0x20] sm:$0xff]   ;;  %v559_v24 = vld [vmem:[#allocation6 + $0x28] sm:$0xff]  }
  0x2e   :  { %475 = vmatprep.subr.bf16.mxu0 %v638_v0  ;;  %495 = vmatprep.subr.bf16.mxu1 %v638_v0  ;;  %v417_v25 = vld [vmem:[%s790_s4] ss:$0 sm:$0xff]  ;;  %v560_v34 = vld [vmem:[#allocation6 + $0x30] sm:$0xff]   ;;  %v561_v35 = vld [vmem:[#allocation6 + $0x38] sm:$0xff]  }
  0x2f   :  { %v426_v36 = vld [vmem:[%s790_s4 + $0x1] ss:$0 sm:$0xff]  ;;  %v443_v47 = vld [vmem:[%s792_s6] ss:$0 sm:$0xff]  ;;  %s640_s4 = smov [#allocation8]  }
  0x30   :  { %s407_s25 = sshll.u32 %s640_s4, 4  ;;  %s408_s25 = int_to_ptr.vmem [resolvable:$true] %s407_s25 }
  0x31   :  { %476 = vmatpush3.bf16.msra.mxu0 %v540_v3  ;;  %496 = vmatpush3.bf16.msra.mxu1 %v548_v8  ;;  %s606_s26 = scalar_lea.vmem %s408_s25, 128  ;;  %p611_p3 = scmp.lt.s32.totalorder %s408_s25, %s408_s25 }
  0x32   :  { %477 = vmatprep.subr.bf16.mxu0 %v638_v0  ;;  %497 = vmatprep.subr.bf16.mxu1 %v638_v0  ;;  %p607_p2 = scmp.ne.s32.totalorder %s408_s25, %s606_s26  ;;  %p612_p4 = scmp.lt.s32.totalorder %s606_s26, %s606_s26 }
  0x34   :  { %p613_p5 = por %p612_p4, %p611_p3 }
  0x35   :  { %478 = vmatpush3.bf16.msra.mxu0 %v541_v5  ;;  %498 = vmatpush3.bf16.msra.mxu1 %v549_v10 }
  0x36   :  { %479 = vmatprep.subr.bf16.mxu0 %v638_v0  ;;  %499 = vmatprep.subr.bf16.mxu1 %v638_v0  ;;  %p614_p6 = pnand %p613_p5, %p607_p2 }
  0x39   :  { %480 = vmatpush3.bf16.msra.mxu0 %v542_v7  ;;  %500 = vmatpush3.bf16.msra.mxu1 %v550_v12 }
  0x3a   :  { %481 = vmatprep.subr.bf16.mxu0 %v638_v0  ;;  %501 = vmatprep.subr.bf16.mxu1 %v638_v0 }
  0x3d   :  { %482 = vmatpush3.bf16.msra.mxu0 %v543_v9  ;;  %502 = vmatpush3.bf16.msra.mxu1 %v551_v15 }
  0x3e   :  { %483 = vmatprep.subr.bf16.mxu0 %v638_v0  ;;  %503 = vmatprep.subr.bf16.mxu1 %v638_v0 }
  0x41   :  { %484 = vmatpush3.bf16.msra.mxu0 %v544_v11  ;;  %504 = vmatpush3.bf16.msra.mxu1 %v552_v17 }
  0x42   :  { %485 = vmatprep.subr.bf16.mxu0 %v638_v0  ;;  %505 = vmatprep.subr.bf16.mxu1 %v638_v0 }
  0x45   :  { %486 = vmatpush3.bf16.msra.mxu0 %v545_v13  ;;  %506 = vmatpush3.bf16.msra.mxu1 %v553_v18 }
  0x46   :  { %511 = vmatprep.subr.bf16.mxu0 %v638_v0 }
  0x48   :  { %488 = vmatmul.mubr.bf16.vlgmr.msra.gmra.mrb[0].mxu0 %v74_v16 }
  0x49   :  { %527 = vmatprep.mubr.msk.bf16.mxu0 %vm639_vm0, %v638_v0  ;;  %512 = vmatpush3.bf16.msra.mxu0 %v554_v19 }
  0x4a   :  { %513 = vmatprep.subr.bf16.mxu0 %v638_v0 }
  0x4d   :  { %514 = vmatpush3.bf16.msra.mxu0 %v555_v20 }
  0x4e   :  { %515 = vmatprep.subr.bf16.mxu0 %v638_v0 }
  0x51   :  { %516 = vmatpush3.bf16.msra.mxu0 %v556_v21 }
  0x52   :  { %517 = vmatprep.subr.bf16.mxu0 %v638_v0 }
  0x55   :  { %518 = vmatpush3.bf16.msra.mxu0 %v557_v22 }
  0x56   :  { %519 = vmatprep.subr.bf16.mxu0 %v638_v0 }
  0x59   :  { %520 = vmatpush3.bf16.msra.mxu0 %v558_v23 }
  0x5a   :  { %521 = vmatprep.subr.bf16.mxu0 %v638_v0 }
  0x5d   :  { %522 = vmatpush3.bf16.msra.mxu0 %v559_v24 }
  0x5e   :  { %523 = vmatprep.subr.bf16.mxu0 %v638_v0 }
  0x61   :  { %524 = vmatpush3.bf16.msra.mxu0 %v560_v34 }
  0x62   :  { %525 = vmatprep.subr.bf16.mxu0 %v638_v0 }
  0x65   :  { %526 = vmatpush3.bf16.msra.mxu0 %v561_v35 }
 0x11b   :  { %v162_v26 = vpop.f32.mrb[0].mxu0 }
 0x11c   :  { %v163_v27 = vadd.f32 %v417_v25, %v162_v26  ;;  %v489_v28 = vpop.f32.mrb[1].mxu0 }
 0x11d   :  { %v165_v29 = vpop.f32.mrb[2].mxu0 }
 0x11e   :  { %vm168_vm1 = vcmp.gt.f32.partialorder %v163_v27, 0.0  ;;  %v169_v30 = vmul.f32 0.2, %v163_v27  ;;  %v490_v31 = vpop.f32.mrb[3].mxu0 }
 0x120   :  { %v170_v32 = vsel %vm168_vm1, %v163_v27, %v169_v30 }
 0x121   :  { %v187_v33 = vpack.c.bf16 %v170_v32, %v170_v32 }
 0x123   :  { %508 = vmatmul.mubr.bf16.vlgmr.msra.gmra.mrb[0].mxu1 %v187_v33 }
 0x1f6   :  { %v275_v37 = vpop.f32.mrb[0].mxu1 }
 0x1f7   :  { %v276_v38 = vadd.f32 %v426_v36, %v275_v37  ;;  %v509_v39 = vpop.f32.mrb[1].mxu1 }
 0x1f8   :  { %v278_v40 = vpop.f32.mrb[2].mxu1 }
 0x1f9   :  { %vm281_vm2 = vcmp.gt.f32.partialorder %v276_v38, 0.0  ;;  %v282_v41 = vmul.f32 0.2, %v276_v38  ;;  %v510_v42 = vpop.f32.mrb[3].mxu1 }
 0x1fb   :  { %v283_v43 = vsel %vm281_vm2, %v276_v38, %v282_v41 }
 0x1fc   :  { %v300_v44 = vpack.c.bf16 %v283_v43, %v283_v43 }
 0x1fe   :  { %528 = vmatmul.mubr.bf16.vlgmr.msra.gmra.mrb[4].mxu0 %v300_v44 }
 0x2d1   :  { %v383_v46 = vpop.f32.mrb[4].mxu0 }
 0x2d2   :  { %v391_v48 = vmul.f32 %v390_v45, %v383_v46  ;;  %v529_v49 = vpop.f32.mrb[5].mxu0 }
 0x2d3   :  { %v386_v50 = vpop.f32.mrb[6].mxu0 }
 0x2d4   :  { %v399_v51 = vadd.f32 %v443_v47, %v391_v48  ;;  %v530_v52 = vpop.f32.mrb[7].mxu0 }
 0x2d6   :  { %400 = vst [vmem:[#allocation8] sm:$0xff] %v399_v51 }
 0x2d7   :  { %617 = shalt.err (!%p614_p6)
}
 0x2d8   :  { %s618_s6 = scalar_lea.hbm %s793_s7, 128 }
 0x2d9   :  { %p619_p7 = scmp.ne.s32.totalorder %s793_s7, %s618_s6  ;;  %p622_p8 = scmp.lt.u32.totalorder %s618_s6, %s793_s7 }
 0x2db   :  { %p624_p9 = pnand %p622_p8, %p619_p7 }
 0x2dd   :  { %627 = shalt.err (!%p624_p9)
}
 0x2de   :  { %410 = dma.vmem_to_hbm [thread:$0]  %s408_s25, 128, %s793_s7, [#allocation5]  }
 0x2df   :  { %632 = dma.done.wait [#allocation5], 128  }
 0x2e0   :  { %633 = vsyncadd [#allocation5], 4294967168 }
 0x2e1   :  { %414 = vsyncpa [#allocation4], 1 }
 0x2e2   :  { %415 = vsyncpa [#allocation7], 1 }
 0x2e3   :  { %416 = vsyncpa [#allocation5], 1 }

</bundles_post_ra>
